<compile_context>
chip_gen: v7x
topology: tpu7x:2x2x1
jax: 0.10.0
libtpu: 0.0.40
codegen_flags: <defaults>
</compile_context>

<pallas_src>
import functools

import jax
import jax.numpy as jnp
from jax.experimental import pallas as pl
from jax.experimental.pallas import tpu as pltpu


def _round_up(n, m):
    return ((n + m - 1) // m) * m


@functools.lru_cache(maxsize=1)
def _single_buffer_mode():
    """pl.Buffered(1) if this JAX supports BlockSpec(pipeline_mode=...), else None.

    Only the spec construction is probed (narrow TypeError), so genuine lowering
    errors in the real pallas_call are never swallowed.
    """
    if not hasattr(pl, "Buffered"):
        return None
    try:
        pl.BlockSpec((8, 128), lambda i: (0, 0), pipeline_mode=pl.Buffered(1))
    except TypeError:
        return None
    return pl.Buffered(1)


def _head_kernel(x_ref, w1_ref, b1_ref, w2_ref, b2_ref, o_ref):
    # x_ref:  (block_b, input_dim)      features dtype (e.g. f32); cast per-tile below
    # w1_ref: (input_dim, inner_pad)    compute dtype (bf16)
    # b1_ref: (1, inner_pad)            f32
    # w2_ref: (inner_pad, cls_pad)      compute dtype (bf16)
    # b2_ref: (1, cls_pad)              f32
    # o_ref:  (block_b, cls_pad)        output dtype
    x = x_ref[...].astype(w1_ref.dtype)          # VPU cast, hidden under DMA/MXU slack

    # dense: x @ W1 on the MXU with f32 accumulation; bias + tanh in f32 (VPU/EUP).
    h = jnp.dot(x, w1_ref[...], preferred_element_type=jnp.float32)
    h = jnp.tanh(h + b1_ref[...])

    # out_proj: h @ W2 on the MXU with f32 accumulation; bias-add in f32.
    out = jnp.dot(h.astype(w2_ref.dtype), w2_ref[...],
                  preferred_element_type=jnp.float32)
    o_ref[...] = (out + b2_ref[...]).astype(o_ref.dtype)


def prepare_head_params(w1, b1, w2, b2, *, compute_dtype=jnp.bfloat16):
    """Pad to lane-dense shapes + cast to the MXU compute dtype ONCE at model setup.

    w1: [input_dim, inner_dim] (pre-transposed), b1: [inner_dim],
    w2: [inner_dim, num_classes] (pre-transposed), b2: [num_classes].

    Zero padding is mathematically safe: padded hidden columns see tanh(0 + 0) = 0
    and the matching padded rows of W2 are exactly zero, so they contribute nothing.
    """
    input_dim, inner_dim = w1.shape
    num_classes = w2.shape[1]
    inner_pad = _round_up(inner_dim, 128)   # lane-dense hidden activation
    cls_pad = _round_up(num_classes, 128)   # lane-dense (unmasked) output stores
    return {
        "w1": jnp.pad(w1, ((0, 0), (0, inner_pad - inner_dim))).astype(compute_dtype),
        "b1": jnp.pad(b1, (0, inner_pad - inner_dim)).reshape(1, inner_pad).astype(jnp.float32),
        "w2": jnp.pad(w2, ((0, inner_pad - inner_dim),
                           (0, cls_pad - num_classes))).astype(compute_dtype),
        "b2": jnp.pad(b2, (0, cls_pad - num_classes)).reshape(1, cls_pad).astype(jnp.float32),
        "input_dim": input_dim,
        "inner_dim": inner_dim,
        "num_classes": num_classes,
        "inner_pad": inner_pad,
        "cls_pad": cls_pad,
    }


def _default_block_b(B):
    if B <= 16:
        # Tiny batch: single tile, sublane-aligned (half-packed bf16 vregs are
        # irrelevant at this size, and block == array keeps the spec trivial).
        return _round_up(B, 8)
    # >=2 grid steps so ("parallel",) shards across v7x's two TensorCores; up to
    # 1024-row tiles on large batches for v5e/v6e per-step-overhead amortization.
    return min(1024, max(16, _round_up(-(-B // 2), 16)))


def sentence_classification_head(features, params, *, block_b=None, out_dtype=None):
    """features: [B, input_dim]; params from prepare_head_params().
    Returns logits [B, num_classes]."""
    B, input_dim = features.shape
    assert input_dim == params["input_dim"], "feature dim mismatch"
    inner_pad, cls_pad = params["inner_pad"], params["cls_pad"]
    num_classes = params["num_classes"]
    if out_dtype is None:
        out_dtype = features.dtype

    if block_b is None:
        block_b = _default_block_b(B)
    # Multiples of 16 preferred (bf16 packs 16 sublanes/vreg); 8 is the hard floor.
    assert block_b % 8 == 0, "block_b must be a multiple of 8 (sublane tiling)"

    # Ragged tail block (B not a multiple of block_b) is handled by Pallas: OOB reads
    # are garbage rows whose output stores are masked off.
    grid = (pl.cdiv(B, block_b),)

    single_buf = _single_buffer_mode()        # one resident copy of W1/W2/biases in VMEM
    weight_bufs = 1 if single_buf is not None else 2

    def _const_spec(shape):
        # Grid-invariant blocks (constant index_map): one VMEM copy is enough.
        if single_buf is not None:
            return pl.BlockSpec(shape, lambda i: (0, 0), pipeline_mode=single_buf)
        return pl.BlockSpec(shape, lambda i: (0, 0))

    in_specs = [
        pl.BlockSpec((block_b, input_dim), lambda i: (i, 0)),
        _const_spec((input_dim, inner_pad)),
        _const_spec((1, inner_pad)),
        _const_spec((inner_pad, cls_pad)),
        _const_spec((1, cls_pad)),
    ]
    out_specs = pl.BlockSpec((block_b, cls_pad), lambda i: (i, 0))

    x_bytes = jnp.dtype(features.dtype).itemsize
    o_bytes = jnp.dtype(out_dtype).itemsize
    w_bytes = jnp.dtype(params["w1"].dtype).itemsize

    # Right-sized VMEM request (never blindly the full physical VMEM of a v7x TC).
    vmem_needed = (
        2 * block_b * input_dim * x_bytes                                   # x (2-buf)
        + 2 * block_b * cls_pad * o_bytes                                   # out (2-buf)
        + weight_bufs * (input_dim * inner_pad + inner_pad * cls_pad) * w_bytes
        + weight_bufs * (inner_pad + cls_pad) * 4                           # biases f32
        + block_b * input_dim * w_bytes                                     # bf16 x copy
        + block_b * inner_pad * (4 + w_bytes)                               # f32 + bf16 h
        + block_b * cls_pad * 4                                             # f32 out
    )
    vmem_limit = int(min(max(16 * 1024 * 1024, vmem_needed + 4 * 1024 * 1024),
                         128 * 1024 * 1024))

    cost = pl.CostEstimate(
        flops=2 * B * input_dim * inner_pad + 2 * B * inner_pad * cls_pad,
        transcendentals=B * inner_pad,
        bytes_accessed=(B * input_dim * x_bytes
                        + (input_dim * inner_pad + inner_pad * cls_pad) * w_bytes
                        + (inner_pad + cls_pad) * 4
                        + B * cls_pad * o_bytes),
    )

    out = pl.pallas_call(
        _head_kernel,
        out_shape=jax.ShapeDtypeStruct((B, cls_pad), out_dtype),
        grid=grid,
        in_specs=in_specs,
        out_specs=out_specs,
        compiler_params=pltpu.CompilerParams(
            dimension_semantics=("parallel",),
            vmem_limit_bytes=vmem_limit,
        ),
        cost_estimate=cost,
    )(features, params["w1"], params["b1"], params["w2"], params["b2"])

    # Lane-padded logit columns sliced off here; a downstream consumer that reads the
    # padded (B, cls_pad) slab directly (e.g. fused argmax/softmax) would avoid this pass.
    return out[:, :num_classes]


def reference_head(features, w1, b1, w2, b2):
    h = jnp.tanh(features @ w1 + b1)
    return h @ w2 + b2


if __name__ == "__main__":
    # Small shapes consistent with the module: features are B x input_dim.
    B = 8
    input_dim = 32
    inner_dim = 64
    num_classes = 4

    key = jax.random.PRNGKey(0)
    k_x, k_w1, k_b1, k_w2, k_b2 = jax.random.split(key, 5)

    features = jax.random.normal(k_x, (B, input_dim), dtype=jnp.float32)

    # Deterministic parameter init (Linear weights stored transposed as [in, out]).
    w1 = jax.random.normal(k_w1, (input_dim, inner_dim), dtype=jnp.float32) * 0.05
    b1 = jax.random.normal(k_b1, (inner_dim,), dtype=jnp.float32) * 0.05
    w2 = jax.random.normal(k_w2, (inner_dim, num_classes), dtype=jnp.float32) * 0.05
    b2 = jax.random.normal(k_b2, (num_classes,), dtype=jnp.float32) * 0.05

    # Pad + cast the weights ONCE at setup (not per forward).
    params = prepare_head_params(w1, b1, w2, b2)

    out = jax.block_until_ready(sentence_classification_head(features, params))
    ref = reference_head(features, w1, b1, w2, b2)
    assert out.shape == (B, num_classes)
    # bf16 compute with f32 accumulation => loosened tolerance vs. the f32 reference.
    assert jnp.allclose(out, ref, atol=2e-2, rtol=2e-2), "mismatch vs reference"

    # Second case: multi-block grid with a ragged tail (B=20, block_b=16 -> grid=2,
    # last block covers only 4 valid rows).
    B2 = 20
    feats2 = jax.random.normal(jax.random.PRNGKey(1), (B2, input_dim), dtype=jnp.float32)
    out2 = jax.block_until_ready(
        sentence_classification_head(feats2, params, block_b=16))
    ref2 = reference_head(feats2, w1, b1, w2, b2)
    assert out2.shape == (B2, num_classes)
    assert jnp.allclose(out2, ref2, atol=2e-2, rtol=2e-2), "mismatch vs reference (grid>1)"

    print("KERNEL_OK")
</pallas_src>

<mosaic_0001>
module attributes {stable_mosaic.version = 11 : i64} {
  func.func @_head_kernel(%arg0: i32, %arg1: memref<8x32xf32, #tpu.memory_space<vmem>>, %arg2: memref<32x128xbf16, #tpu.memory_space<vmem>>, %arg3: memref<1x128xf32, #tpu.memory_space<vmem>>, %arg4: memref<128x128xbf16, #tpu.memory_space<vmem>>, %arg5: memref<1x128xf32, #tpu.memory_space<vmem>>, %arg6: memref<8x128xf32, #tpu.memory_space<vmem>>) attributes {dimension_semantics = [#tpu.dimension_semantics<parallel>], iteration_bounds = array<i64: 1>, scalar_prefetch = 0 : i64, scratch_operands = 0 : i64, tpu.core_type = #tpu.core_type<tc>, window_params = [{transform_indices = @transform_0, window_bounds = array<i64: 8, 32>}, {pipeline_mode = #tpu.pipeline_mode<synchronous>, transform_indices = @transform_1, window_bounds = array<i64: 32, 128>}, {pipeline_mode = #tpu.pipeline_mode<synchronous>, transform_indices = @transform_2, window_bounds = array<i64: 1, 128>}, {pipeline_mode = #tpu.pipeline_mode<synchronous>, transform_indices = @transform_3, window_bounds = array<i64: 128, 128>}, {pipeline_mode = #tpu.pipeline_mode<synchronous>, transform_indices = @transform_4, window_bounds = array<i64: 1, 128>}, {transform_indices = @transform_5, window_bounds = array<i64: 8, 128>}]} {
    %c0 = arith.constant 0 : index
    %c0_0 = arith.constant 0 : index
    %0 = vector.load %arg1[%c0, %c0_0] : memref<8x32xf32, #tpu.memory_space<vmem>>, vector<8x32xf32>
    %1 = arith.truncf %0 : vector<8x32xf32> to vector<8x32xbf16>
    %c0_1 = arith.constant 0 : index
    %c0_2 = arith.constant 0 : index
    %2 = vector.load %arg2[%c0_1, %c0_2] : memref<32x128xbf16, #tpu.memory_space<vmem>>, vector<32x128xbf16>
    %cst = arith.constant dense<0.000000e+00> : vector<8x128xf32>
    %3 = tpu.matmul %1, %2, %cst {dimension_numbers = #tpu.dot_dimension_numbers<[1], [0], [0], [1], [0, 0, 1, 1], [], []>} : vector<8x32xbf16>, vector<32x128xbf16>, vector<8x128xf32> -> vector<8x128xf32>
    %c0_3 = arith.constant 0 : index
    %c0_4 = arith.constant 0 : index
    %4 = vector.load %arg3[%c0_3, %c0_4] : memref<1x128xf32, #tpu.memory_space<vmem>>, vector<1x128xf32>
    %5 = vector.broadcast %4 : vector<1x128xf32> to vector<8x128xf32>
    %6 = arith.addf %3, %5 : vector<8x128xf32>
    %7 = math.tanh %6 : vector<8x128xf32>
    %8 = arith.truncf %7 : vector<8x128xf32> to vector<8x128xbf16>
    %c0_5 = arith.constant 0 : index
    %c0_6 = arith.constant 0 : index
    %9 = vector.load %arg4[%c0_5, %c0_6] : memref<128x128xbf16, #tpu.memory_space<vmem>>, vector<128x128xbf16>
    %cst_7 = arith.constant dense<0.000000e+00> : vector<8x128xf32>
    %10 = tpu.matmul %8, %9, %cst_7 {dimension_numbers = #tpu.dot_dimension_numbers<[1], [0], [0], [1], [0, 0, 1, 1], [], []>} : vector<8x128xbf16>, vector<128x128xbf16>, vector<8x128xf32> -> vector<8x128xf32>
    %c0_8 = arith.constant 0 : index
    %c0_9 = arith.constant 0 : index
    %11 = vector.load %arg5[%c0_8, %c0_9] : memref<1x128xf32, #tpu.memory_space<vmem>>, vector<1x128xf32>
    %12 = vector.broadcast %11 : vector<1x128xf32> to vector<8x128xf32>
    %13 = arith.addf %10, %12 : vector<8x128xf32>
    %c0_10 = arith.constant 0 : index
    %c0_11 = arith.constant 0 : index
    %14 = vector.load %arg6[%c0_10, %c0_11] : memref<8x128xf32, #tpu.memory_space<vmem>>, vector<8x128xf32>
    tpu.vector_store %arg6[%c0_10, %c0_11], %13 {strides = array<i32>} : memref<8x128xf32, #tpu.memory_space<vmem>>, vector<8x128xf32>,
    return
  }
  func.func @transform_0(%arg0: i32) -> (i32, i32) {
    %c0_i32 = arith.constant 0 : i32
    %c0_i32_0 = arith.constant 0 : i32
    return %arg0, %c0_i32 : i32, i32
  }
  func.func @transform_1(%arg0: i32) -> (i32, i32) {
    %c0_i32 = arith.constant 0 : i32
    %c0_i32_0 = arith.constant 0 : i32
    %c0_i32_1 = arith.constant 0 : i32
    return %c0_i32, %c0_i32_0 : i32, i32
  }
  func.func @transform_2(%arg0: i32) -> (i32, i32) {
    %c0_i32 = arith.constant 0 : i32
    %c0_i32_0 = arith.constant 0 : i32
    %c0_i32_1 = arith.constant 0 : i32
    return %c0_i32, %c0_i32_0 : i32, i32
  }
  func.func @transform_3(%arg0: i32) -> (i32, i32) {
    %c0_i32 = arith.constant 0 : i32
    %c0_i32_0 = arith.constant 0 : i32
    %c0_i32_1 = arith.constant 0 : i32
    return %c0_i32, %c0_i32_0 : i32, i32
  }
  func.func @transform_4(%arg0: i32) -> (i32, i32) {
    %c0_i32 = arith.constant 0 : i32
    %c0_i32_0 = arith.constant 0 : i32
    %c0_i32_1 = arith.constant 0 : i32
    return %c0_i32, %c0_i32_0 : i32, i32
  }
  func.func @transform_5(%arg0: i32) -> (i32, i32) {
    %c0_i32 = arith.constant 0 : i32
    %c0_i32_0 = arith.constant 0 : i32
    return %arg0, %c0_i32 : i32, i32
  }
}

</mosaic_0001>

<bundles_post_ra>
// kernel: tpu_custom_call.1
= control target key start
LH: loop header
LB: loop body
LE: loop exit
PB: predicated region body
PF: predicated region fallthrough
CT: control target
= control target key end

     0   :  { %10 = vsyncpa [#allocation3], 0  ;;  %s525_s0 = inlined_call_operand.hbm [shape: f32[8,32], index: 0, kind: input, shape index: {}]   ;;  %s526_s1 = inlined_call_operand.hbm [shape: bf16[32,128], index: 1, kind: input, shape index: {}]   ;;  %s527_s2 = inlined_call_operand.vmem [shape: f32[1,128], index: 2, kind: input, shape index: {}]   ;;  %s528_s3 = inlined_call_operand.hbm [shape: bf16[128,128], index: 3, kind: input, shape index: {}]   ;;  %s529_s4 = inlined_call_operand.vmem [shape: f32[1,128], index: 4, kind: input, shape index: {}]   ;;  %s530_s5 = inlined_call_operand.hbm [shape: f32[8,128], index: 5, kind: output, shape index: {}]  }
   0x1   :  { %11 = vsyncpa [#allocation6], 0 }
   0x2   :  { %12 = vsyncpa [#allocation4], 0  ;;  %s427_s18 = smov [#allocation5]   ;;  %s333_s22 = scalar_lea.hbm %s526_s1, 256 }
   0x3   :  { %s28_s19 = sshll.u32 %s427_s18, 4  ;;  %p334_p0 = scmp.ne.s32.totalorder %s526_s1, %s333_s22  ;;  %s29_s19 = int_to_ptr.vmem [resolvable:$true] %s28_s19 }
   0x4   :  { %p337_p1 = scmp.lt.u32.totalorder %s333_s22, %s526_s1 }
   0x6   :  { %p339_p2 = pnand %p337_p1, %p334_p0 }
   0x8   :  { %342 = shalt.err (!%p339_p2)
}
   0x9   :  { %s343_s27 = scalar_lea.vmem %s29_s19, 256  ;;  %p348_p4 = scmp.lt.s32.totalorder %s29_s19, %s29_s19 }
   0xa   :  { %p344_p3 = scmp.ne.s32.totalorder %s29_s19, %s343_s27  ;;  %p349_p5 = scmp.lt.s32.totalorder %s343_s27, %s343_s27 }
   0xc   :  { %p350_p6 = por %p349_p5, %p348_p4 }
   0xe   :  { %p351_p7 = pnand %p350_p6, %p344_p3 }
  0x10   :  { %354 = shalt.err (!%p351_p7)
}
  0x11   :  { %s428_s28 = smov 64   ;;  %s429_s29 = smov 4  }
  0x12   :  { %34 = dma.hbm_to_vmem [thread:$0]  %s526_s1, 256, %s29_s19, [#allocation6], %s428_s28, %s428_s28, %s429_s29  }
  0x13   :  { %s430_s7 = smov [#allocation2]   ;;  %s431_s9 = smov [#allocation7]  }
  0x14   :  { %s19_s8 = sshll.u32 %s430_s7, 4  ;;  %s42_s10 = sshll.u32 %s431_s9, 4  ;;  %s20_s8 = int_to_ptr.vmem [resolvable:$true] %s19_s8  ;;  %s43_s10 = int_to_ptr.vmem [resolvable:$true] %s42_s10 }
  0x15   :  { %s355_s13 = scalar_lea.hbm %s525_s0, 128 }
  0x16   :  { %p356_p8 = scmp.ne.s32.totalorder %s525_s0, %s355_s13  ;;  %p359_p9 = scmp.lt.u32.totalorder %s355_s13, %s525_s0 }
  0x18   :  { %p361_p10 = pnand %p359_p9, %p356_p8 }
  0x1a   :  { %364 = shalt.err (!%p361_p10)
}
  0x1b   :  { %s365_s1 = scalar_lea.vmem %s20_s8, 128  ;;  %p370_p12 = scmp.lt.s32.totalorder %s20_s8, %s20_s8 }
  0x1c   :  { %p366_p11 = scmp.ne.s32.totalorder %s20_s8, %s365_s1  ;;  %p371_p13 = scmp.lt.s32.totalorder %s365_s1, %s365_s1 }
  0x1e   :  { %p372_p0 = por %p371_p13, %p370_p12 }
  0x20   :  { %p373_p1 = pnand %p372_p0, %p366_p11 }
  0x22   :  { %376 = shalt.err (!%p373_p1)
}
  0x23   :  { %22 = dma.hbm_to_vmem [thread:$0]  %s525_s0, 128, %s20_s8, [#allocation3]  }
  0x24   :  { %s377_s22 = scalar_lea.hbm %s528_s3, 1024 }
  0x25   :  { %p378_p2 = scmp.ne.s32.totalorder %s528_s3, %s377_s22  ;;  %p381_p3 = scmp.lt.u32.totalorder %s377_s22, %s528_s3 }
  0x27   :  { %p383_p4 = pnand %p381_p3, %p378_p2 }
  0x29   :  { %386 = shalt.err (!%p383_p4)
}
  0x2a   :  { %s387_s27 = scalar_lea.vmem %s43_s10, 1024  ;;  %p392_p6 = scmp.lt.s32.totalorder %s43_s10, %s43_s10 }
  0x2b   :  { %p388_p5 = scmp.ne.s32.totalorder %s43_s10, %s387_s27  ;;  %p393_p7 = scmp.lt.s32.totalorder %s387_s27, %s387_s27 }
  0x2d   :  { %p394_p8 = por %p393_p7, %p392_p6 }
  0x2f   :  { %p395_p9 = pnand %p394_p8, %p388_p5 }
  0x31   :  { %398 = shalt.err (!%p395_p9)
}
  0x32   :  { %48 = dma.hbm_to_vmem [thread:$0]  %s528_s3, 1024, %s43_s10, [#allocation6], %s428_s28, %s428_s28, %s429_s29  }
  0x33   :  { %421 = dma.done.wait [#allocation3], 128  }
  0x34   :  { %422 = vsyncadd [#allocation3], 4294967168 }
  0x35   :  { %423 = dma.done.wait [#allocation6], 1280  }
  0x36   :  { %424 = vsyncadd [#allocation6], 4294966016  ;;  %v432_v0 = vmov 0.0   ;;  %vm433_vm0 = vmmov 0   ;;  %v321_v1 = vld [vmem:[#allocation5] sm:$0xff]   ;;  %v322_v2 = vld [vmem:[#allocation5 + $0x8] sm:$0xff]  }
  0x37   :  { %285 = vmatprep.subr.bf16.mxu0 %v432_v0  ;;  %289 = vmatprep.mubr.msk.bf16.mxu0 %vm433_vm0, %v432_v0  ;;  %v61_v3 = vld [vmem:[#allocation2] sm:$0xff]  ;;  %v323_v4 = vld [vmem:[#allocation7] sm:$0xff]   ;;  %vm86_vm1 = vcmask 261120   ;;  %v325_v7 = vld [vmem:[#allocation7 + $0x10] sm:$0xff]   ;;  %s434_s7 = smov [#allocation8]  }
  0x38   :  { %293 = vmatprep.subr.bf16.mxu1 %v432_v0  ;;  %309 = vmatprep.mubr.msk.bf16.mxu1 %vm433_vm0, %v432_v0  ;;  %v62_v5 = vpack.c.bf16 %v61_v3, %v61_v3  ;;  %v324_v6 = vld [vmem:[#allocation7 + $0x8] sm:$0xff]   ;;  %v326_v8 = vld [vmem:[#allocation7 + $0x18] sm:$0xff]   ;;  %v327_v9 = vld [vmem:[#allocation7 + $0x20] sm:$0xff]   ;;  %s250_s8 = sshll.u32 %s434_s7, 4  ;;  %s251_s8 = int_to_ptr.vmem [resolvable:$true] %s250_s8 }
  0x39   :  { %286 = vmatpush3.bf16.msra.mxu0 %v321_v1  ;;  %294 = vmatpush3.bf16.msra.mxu1 %v323_v4  ;;  %v328_v10 = vld [vmem:[#allocation7 + $0x28] sm:$0xff]   ;;  %v329_v11 = vld [vmem:[#allocation7 + $0x30] sm:$0xff]   ;;  %v330_v12 = vld [vmem:[#allocation7 + $0x38] sm:$0xff]   ;;  %p404_p11 = scmp.lt.s32.totalorder %s251_s8, %s251_s8 }
  0x3a   :  { %287 = vmatprep.subr.bf16.mxu0 %v432_v0  ;;  %295 = vmatprep.subr.bf16.mxu1 %v432_v0  ;;  %v260_v13 = vld [vmem:[%s527_s2] ss:$0 sm:$0xff]  ;;  %s399_s2 = scalar_lea.vmem %s251_s8, 128 }
  0x3b   :  { %v264_v21 = vld [vmem:[%s529_s4] ss:$0 sm:$0xff]  ;;  %p400_p10 = scmp.ne.s32.totalorder %s251_s8, %s399_s2  ;;  %p405_p12 = scmp.lt.s32.totalorder %s399_s2, %s399_s2 }
  0x3d   :  { %288 = vmatpush3.bf16.msra.mxu0 %v322_v2  ;;  %296 = vmatpush3.bf16.msra.mxu1 %v324_v6  ;;  %p406_p13 = por %p405_p12, %p404_p11 }
  0x3e   :  { %297 = vmatprep.subr.bf16.mxu1 %v432_v0 }
  0x3f   :  { %p407_p0 = pnand %p406_p13, %p400_p10 }
  0x40   :  { %290 = vmatmul.mubr.msk.bf16.vlgmr.msra.gmra.mrb[0].mxu0 %vm86_vm1, %v62_v5 }
  0x41   :  { %298 = vmatpush3.bf16.msra.mxu1 %v325_v7 }
  0x42   :  { %299 = vmatprep.subr.bf16.mxu1 %v432_v0 }
  0x45   :  { %300 = vmatpush3.bf16.msra.mxu1 %v326_v8 }
  0x46   :  { %301 = vmatprep.subr.bf16.mxu1 %v432_v0 }
  0x49   :  { %302 = vmatpush3.bf16.msra.mxu1 %v327_v9 }
  0x4a   :  { %303 = vmatprep.subr.bf16.mxu1 %v432_v0 }
  0x4d   :  { %304 = vmatpush3.bf16.msra.mxu1 %v328_v10 }
  0x4e   :  { %305 = vmatprep.subr.bf16.mxu1 %v432_v0 }
  0x51   :  { %306 = vmatpush3.bf16.msra.mxu1 %v329_v11 }
  0x52   :  { %307 = vmatprep.subr.bf16.mxu1 %v432_v0 }
  0x55   :  { %308 = vmatpush3.bf16.msra.mxu1 %v330_v12 }
 0x113   :  { %v124_v14 = vpop.f32.mrb[0].mxu0 }
 0x114   :  { %v125_v15 = vadd.f32 %v260_v13, %v124_v14  ;;  %v291_v16 = vpop.f32.mrb[1].mxu0 }
 0x115   :  { %v127_v17 = vpop.f32.mrb[2].mxu0 }
 0x116   :  { %331 = vtanh.f32 %v125_v15  ;;  %v292_v18 = vpop.f32.mrb[3].mxu0 }
 0x120   :  { %v332_v19 = vpop.eup %331 }
 0x121   :  { %v131_v20 = vpack.c.bf16 %v332_v19, %v332_v19 }
 0x123   :  { %310 = vmatmul.mubr.bf16.vlgmr.msra.gmra.mrb[0].mxu1 %v131_v20 }
 0x1f6   :  { %v237_v22 = vpop.f32.mrb[0].mxu1 }
 0x1f7   :  { %v238_v23 = vadd.f32 %v264_v21, %v237_v22  ;;  %v311_v24 = vpop.f32.mrb[1].mxu1 }
 0x1f8   :  { %v240_v25 = vpop.f32.mrb[2].mxu1 }
 0x1f9   :  { %243 = vst [vmem:[#allocation8] sm:$0xff] %v238_v23  ;;  %v312_v26 = vpop.f32.mrb[3].mxu1 }
 0x1fa   :  { %410 = shalt.err (!%p407_p0)
}
 0x1fb   :  { %s411_s4 = scalar_lea.hbm %s530_s5, 128 }
 0x1fc   :  { %p412_p1 = scmp.ne.s32.totalorder %s530_s5, %s411_s4  ;;  %p415_p2 = scmp.lt.u32.totalorder %s411_s4, %s530_s5 }
 0x1fe   :  { %p417_p3 = pnand %p415_p2, %p412_p1 }
 0x200   :  { %420 = shalt.err (!%p417_p3)
}
 0x201   :  { %253 = dma.vmem_to_hbm [thread:$0]  %s251_s8, 128, %s530_s5, [#allocation4]  }
 0x202   :  { %425 = dma.done.wait [#allocation4], 128  }
 0x203   :  { %426 = vsyncadd [#allocation4], 4294967168 }
 0x204   :  { %257 = vsyncpa [#allocation3], 1 }
 0x205   :  { %258 = vsyncpa [#allocation6], 1 }
 0x206   :  { %259 = vsyncpa [#allocation4], 1 }

</bundles_post_ra>
